<compile_context>
chip_gen: v5e
topology: v5e:2x2
jax: 0.10.0
libtpu: 0.0.40
codegen_flags: <defaults>
</compile_context>

<pallas_src>
import functools

import jax
import jax.numpy as jnp
from jax import lax
from jax.experimental import pallas as pl
from jax.experimental.pallas import tpu as pltpu


def _round_up(x, m):
    return (x + m - 1) // m * m


# -----------------------------------------------------------------------------
# Fused GeoConv kernel:
#   tanh(Linear(4->16)) -> Conv1d(16->F, K) -> ELU -> concat(local_dist)
# -----------------------------------------------------------------------------
def geoconv_kernel(locs_ref, dis_ref, w1_ref, b1_ref, wconv_ref, bconv_ref,
                   out_ref, *, kernel_size, num_filter, dist_mean, dist_std):
    # locs_ref : (Bt, L, 4)        dis_ref : (Bt, L, 1)
    # w1_ref   : (4, 16)           b1_ref  : (1, 16)
    # wconv_ref: (K*16, Fpad)      bconv_ref: (1, Fpad)   (padded cols are 0)
    # out_ref  : (Bt, Lp, Fpad)    with Lp = L - K + 1
    Bt, L, _ = locs_ref.shape
    K = kernel_size
    Lp = out_ref.shape[1]
    Fpad = out_ref.shape[2]

    # --- Linear(4 -> 16) + tanh as ONE matmul over Bt*L rows -----------------
    locs = locs_ref[...].reshape(Bt * L, 4)
    h = jnp.tanh(jnp.dot(locs, w1_ref[...], preferred_element_type=jnp.float32)
                 + b1_ref[...])                                    # (Bt*L, 16)
    h = h.reshape(Bt, L, 16)

    # --- Conv1d(16 -> F, K) as a single (Bt*Lp, K*16) @ (K*16, Fpad) ---------
    hcat = jnp.concatenate([h[:, k:k + Lp, :] for k in range(K)], axis=-1)
    hcat = hcat.reshape(Bt * Lp, K * 16)
    conv = jnp.dot(hcat, wconv_ref[...], preferred_element_type=jnp.float32)
    conv = conv.reshape(Bt, Lp, Fpad) + bconv_ref[...]
    # ELU(alpha=1); padded channels are exactly 0 (zero weights/bias -> elu(0)=0)
    conv = jnp.where(conv > 0.0, conv,
                     jnp.exp(jnp.minimum(conv, 0.0)) - 1.0)

    # --- local dist feature (get_local_seq semantics, incl. double normalize) -
    dis_n = (dis_ref[...] - dist_mean) / dist_std                  # (Bt, L, 1)
    local = dis_n[:, K - 1:, :] - dis_n[:, :Lp, :]                 # (Bt, Lp, 1)
    local = (local - dist_mean) / dist_std

    # write local dist into channel `num_filter` of the lane-dense output slab
    lane = lax.broadcasted_iota(jnp.int32, (Bt, Lp, Fpad), 2)
    local_b = jnp.broadcast_to(local, (Bt, Lp, Fpad))
    out_ref[...] = conv + jnp.where(lane == num_filter, local_b, 0.0)


# -----------------------------------------------------------------------------
# Wrapper: input prep (normalize + state embedding) + pallas_call + strip pad
# -----------------------------------------------------------------------------
def geo_conv_forward(params, data_feature, batch, kernel_size, *,
                     batch_tile=None):
    longi = batch['current_longi'].astype(jnp.float32)
    lati = batch['current_lati'].astype(jnp.float32)
    state = batch['current_state'].astype(jnp.int32)
    dis = batch['current_dis'].astype(jnp.float32)

    B, L = longi.shape
    K = kernel_size
    Lp = L - K + 1
    assert Lp > 0, "sequence must be longer than the conv kernel"
    F = params['w_conv'].shape[-1]
    Fpad = _round_up(F + 1, 128)                     # lane-dense output slab

    # --- tiny input prep (normalize + embedding lookup); fused by XLA --------
    lngs = ((longi - data_feature['longi_mean'])
            / data_feature['longi_std'])[..., None]                  # (B,L,1)
    lats = ((lati - data_feature['lati_mean'])
            / data_feature['lati_std'])[..., None]                   # (B,L,1)
    states = jnp.take(params['state_em'], state, axis=0)             # (B,L,2)
    locs = jnp.concatenate([lngs, lats, states], axis=2).astype(jnp.float32)
    dis3 = dis[..., None]                                            # (B,L,1)

    # --- flatten + zero-pad conv weights to (K*16, Fpad) ---------------------
    wflat = params['w_conv'].reshape(K * 16, F)
    wflat = jnp.pad(wflat, ((0, 0), (0, Fpad - F)))
    bflat = jnp.pad(params['b_conv'].reshape(1, F), ((0, 0), (0, Fpad - F)))

    # --- batch tiling: fold batch rows into the matmul M dimension -----------
    if batch_tile is None:
        batch_tile = min(B, max(1, -(-256 // L)))    # aim for Bt*L >= 256 rows
    Bt = batch_tile
    Bpad = _round_up(B, Bt)
    if Bpad != B:
        locs = jnp.pad(locs, ((0, Bpad - B), (0, 0), (0, 0)))
        dis3 = jnp.pad(dis3, ((0, Bpad - B), (0, 0), (0, 0)))

    kernel = functools.partial(
        geoconv_kernel,
        kernel_size=K,
        num_filter=F,
        dist_mean=float(data_feature['dist_gap_mean']),
        dist_std=float(data_feature['dist_gap_std']),
    )

    out = pl.pallas_call(
        kernel,
        out_shape=jax.ShapeDtypeStruct((Bpad, Lp, Fpad), jnp.float32),
        grid=(Bpad // Bt,),
        in_specs=[
            pl.BlockSpec((Bt, L, 4), lambda i: (i, 0, 0)),
            pl.BlockSpec((Bt, L, 1), lambda i: (i, 0, 0)),
            pl.BlockSpec((4, 16), lambda i: (0, 0)),
            pl.BlockSpec((1, 16), lambda i: (0, 0)),
            pl.BlockSpec((K * 16, Fpad), lambda i: (0, 0)),
            pl.BlockSpec((1, Fpad), lambda i: (0, 0)),
        ],
        out_specs=pl.BlockSpec((Bt, Lp, Fpad), lambda i: (i, 0, 0)),
        compiler_params=pltpu.CompilerParams(
            dimension_semantics=("parallel",)),
    )(locs, dis3, params['w_coords'], params['b_coords'], wflat, bflat)

    # strip batch padding and the lane padding of the feature dim
    return out[:B, :, :F + 1]


# -----------------------------------------------------------------------------
# Pure-JAX reference (same math, no Pallas) for a correctness check
# -----------------------------------------------------------------------------
def geo_conv_reference(params, data_feature, batch, kernel_size):
    longi = batch['current_longi'].astype(jnp.float32)
    lati = batch['current_lati'].astype(jnp.float32)
    state = batch['current_state'].astype(jnp.int32)
    dis = batch['current_dis'].astype(jnp.float32)
    B, L = longi.shape
    K = kernel_size
    Lp = L - K + 1
    F = params['w_conv'].shape[-1]

    lngs = ((longi - data_feature['longi_mean'])
            / data_feature['longi_std'])[..., None]
    lats = ((lati - data_feature['lati_mean'])
            / data_feature['lati_std'])[..., None]
    states = jnp.take(params['state_em'], state, axis=0)
    locs = jnp.concatenate([lngs, lats, states], axis=2)
    h = jnp.tanh(locs @ params['w_coords'] + params['b_coords'])     # (B,L,16)

    conv = params['b_conv'].reshape(1, 1, F)
    for k in range(K):
        conv = conv + jnp.einsum('blc,cf->blf', h[:, k:k + Lp, :],
                                 params['w_conv'][k])
    conv = jnp.where(conv > 0.0, conv, jnp.exp(jnp.minimum(conv, 0.0)) - 1.0)

    dis_n = (dis - data_feature['dist_gap_mean']) / data_feature['dist_gap_std']
    local = dis_n[:, K - 1:] - dis_n[:, :Lp]
    local = ((local - data_feature['dist_gap_mean'])
             / data_feature['dist_gap_std'])[..., None]
    return jnp.concatenate([conv, local], axis=2)


# -----------------------------------------------------------------------------
# Deterministic parameter init + example run
# -----------------------------------------------------------------------------
def init_params(key, kernel_size, num_filter):
    ks = jax.random.split(key, 5)
    s = 0.1
    return {
        'state_em': s * jax.random.normal(ks[0], (2, 2), jnp.float32),
        'w_coords': s * jax.random.normal(ks[1], (4, 16), jnp.float32),
        'b_coords': s * jax.random.normal(ks[2], (1, 16), jnp.float32),
        # conv weight stored as (K, Cin=16, F)  (= PyTorch (F,16,K) transposed)
        'w_conv': s * jax.random.normal(
            ks[3], (kernel_size, 16, num_filter), jnp.float32),
        'b_conv': s * jax.random.normal(ks[4], (1, num_filter), jnp.float32),
    }


if __name__ == "__main__":
    B, L = 2, 16
    kernel_size, num_filter = 3, 32

    key = jax.random.PRNGKey(0)
    kp, k1, k2, k3, k4 = jax.random.split(key, 5)

    params = init_params(kp, kernel_size, num_filter)
    data_feature = {
        'longi_mean': 120.0, 'longi_std': 0.5,
        'lati_mean': 30.0, 'lati_std': 0.3,
        'dist_gap_mean': 0.2, 'dist_gap_std': 1.5,
    }
    batch = {
        'current_longi': 120.0 + 0.5 * jax.random.normal(k1, (B, L), jnp.float32),
        'current_lati': 30.0 + 0.3 * jax.random.normal(k2, (B, L), jnp.float32),
        'current_dis': 0.2 + 1.5 * jax.random.normal(k3, (B, L), jnp.float32),
        'current_state': jax.random.bernoulli(k4, 0.5, (B, L)).astype(jnp.int32),
    }

    conv_locs = geo_conv_forward(params, data_feature, batch, kernel_size)
    jax.block_until_ready(conv_locs)

    assert conv_locs.shape == (B, L - kernel_size + 1, num_filter + 1)

    ref = geo_conv_reference(params, data_feature, batch, kernel_size)
    assert jnp.allclose(conv_locs, ref, atol=1e-5, rtol=1e-5), \
        float(jnp.max(jnp.abs(conv_locs - ref)))

    print("KERNEL_OK")
</pallas_src>

<mosaic_0001>
module attributes {stable_mosaic.version = 11 : i64} {
  func.func @geoconv_kernel(%arg0: i32, %arg1: memref<2x16x4xf32, #tpu.memory_space<vmem>>, %arg2: memref<2x16x1xf32, #tpu.memory_space<vmem>>, %arg3: memref<4x16xf32, #tpu.memory_space<vmem>>, %arg4: memref<1x16xf32, #tpu.memory_space<vmem>>, %arg5: memref<48x128xf32, #tpu.memory_space<vmem>>, %arg6: memref<1x128xf32, #tpu.memory_space<vmem>>, %arg7: memref<2x14x128xf32, #tpu.memory_space<vmem>>) attributes {dimension_semantics = [#tpu.dimension_semantics<parallel>], iteration_bounds = array<i64: 1>, scalar_prefetch = 0 : i64, scratch_operands = 0 : i64, tpu.core_type = #tpu.core_type<tc>, window_params = [{transform_indices = @transform_0, window_bounds = array<i64: 2, 16, 4>}, {transform_indices = @transform_1, window_bounds = array<i64: 2, 16, 1>}, {pipeline_mode = #tpu.pipeline_mode<synchronous>, transform_indices = @transform_2, window_bounds = array<i64: 4, 16>}, {pipeline_mode = #tpu.pipeline_mode<synchronous>, transform_indices = @transform_3, window_bounds = array<i64: 1, 16>}, {pipeline_mode = #tpu.pipeline_mode<synchronous>, transform_indices = @transform_4, window_bounds = array<i64: 48, 128>}, {pipeline_mode = #tpu.pipeline_mode<synchronous>, transform_indices = @transform_5, window_bounds = array<i64: 1, 128>}, {transform_indices = @transform_6, window_bounds = array<i64: 2, 14, 128>}]} {
    %c0 = arith.constant 0 : index
    %c0_0 = arith.constant 0 : index
    %c0_1 = arith.constant 0 : index
    %0 = vector.load %arg1[%c0, %c0_0, %c0_1] : memref<2x16x4xf32, #tpu.memory_space<vmem>>, vector<2x16x4xf32>
    %1 = vector.shape_cast %0 : vector<2x16x4xf32> to vector<32x4xf32>
    %c0_2 = arith.constant 0 : index
    %c0_3 = arith.constant 0 : index
    %2 = vector.load %arg3[%c0_2, %c0_3] : memref<4x16xf32, #tpu.memory_space<vmem>>, vector<4x16xf32>
    %cst = arith.constant dense<0.000000e+00> : vector<32x16xf32>
    %3 = tpu.matmul %1, %2, %cst {dimension_numbers = #tpu.dot_dimension_numbers<[1], [0], [0], [1], [0, 0, 1, 1], [], []>} : vector<32x4xf32>, vector<4x16xf32>, vector<32x16xf32> -> vector<32x16xf32>
    %c0_4 = arith.constant 0 : index
    %c0_5 = arith.constant 0 : index
    %4 = vector.load %arg4[%c0_4, %c0_5] : memref<1x16xf32, #tpu.memory_space<vmem>>, vector<1x16xf32>
    %5 = vector.broadcast %4 : vector<1x16xf32> to vector<32x16xf32>
    %6 = arith.addf %3, %5 : vector<32x16xf32>
    %7 = math.tanh %6 : vector<32x16xf32>
    %8 = vector.shape_cast %7 : vector<32x16xf32> to vector<2x16x16xf32>
    %9 = vector.extract_strided_slice %8 {offsets = [0, 0, 0], sizes = [2, 14, 16], strides = [1, 1, 1]} : vector<2x16x16xf32> to vector<2x14x16xf32>
    %10 = vector.extract_strided_slice %8 {offsets = [0, 1, 0], sizes = [2, 14, 16], strides = [1, 1, 1]} : vector<2x16x16xf32> to vector<2x14x16xf32>
    %11 = vector.extract_strided_slice %8 {offsets = [0, 2, 0], sizes = [2, 14, 16], strides = [1, 1, 1]} : vector<2x16x16xf32> to vector<2x14x16xf32>
    %12 = tpu.concatenate %9, %10, %11 in 2 : vector<2x14x16xf32>, vector<2x14x16xf32>, vector<2x14x16xf32> -> vector<2x14x48xf32>
    %13 = vector.shape_cast %12 : vector<2x14x48xf32> to vector<28x48xf32>
    %c0_6 = arith.constant 0 : index
    %c0_7 = arith.constant 0 : index
    %14 = vector.load %arg5[%c0_6, %c0_7] : memref<48x128xf32, #tpu.memory_space<vmem>>, vector<48x128xf32>
    %cst_8 = arith.constant dense<0.000000e+00> : vector<28x128xf32>
    %15 = tpu.matmul %13, %14, %cst_8 {dimension_numbers = #tpu.dot_dimension_numbers<[1], [0], [0], [1], [0, 0, 1, 1], [], []>} : vector<28x48xf32>, vector<48x128xf32>, vector<28x128xf32> -> vector<28x128xf32>
    %16 = vector.shape_cast %15 : vector<28x128xf32> to vector<2x14x128xf32>
    %c0_9 = arith.constant 0 : index
    %c0_10 = arith.constant 0 : index
    %17 = vector.load %arg6[%c0_9, %c0_10] : memref<1x128xf32, #tpu.memory_space<vmem>>, vector<1x128xf32>
    %18 = vector.shape_cast %17 : vector<1x128xf32> to vector<1x1x128xf32>
    %19 = vector.broadcast %18 : vector<1x1x128xf32> to vector<2x14x128xf32>
    %20 = arith.addf %16, %19 : vector<2x14x128xf32>
    %cst_11 = arith.constant 0.000000e+00 : f32
    %21 = vector.broadcast %cst_11 : f32 to vector<2x14x128xf32>
    %22 = arith.cmpf ogt, %20, %21 : vector<2x14x128xf32>
    %cst_12 = arith.constant 0.000000e+00 : f32
    %23 = vector.broadcast %cst_12 : f32 to vector<2x14x128xf32>
    %24 = arith.minimumf %20, %23 : vector<2x14x128xf32>
    %25 = math.exp %24 : vector<2x14x128xf32>
    %cst_13 = arith.constant 1.000000e+00 : f32
    %26 = vector.broadcast %cst_13 : f32 to vector<2x14x128xf32>
    %27 = arith.subf %25, %26 : vector<2x14x128xf32>
    %28 = arith.select %22, %20, %27 : vector<2x14x128xi1>, vector<2x14x128xf32>
    %c0_14 = arith.constant 0 : index
    %c0_15 = arith.constant 0 : index
    %c0_16 = arith.constant 0 : index
    %29 = vector.load %arg2[%c0_14, %c0_15, %c0_16] : memref<2x16x1xf32, #tpu.memory_space<vmem>>, vector<2x16x1xf32>
    %cst_17 = arith.constant 2.000000e-01 : f32
    %30 = vector.broadcast %cst_17 : f32 to vector<2x16x1xf32>
    %31 = arith.subf %29, %30 : vector<2x16x1xf32>
    %cst_18 = arith.constant 1.500000e+00 : f32
    %32 = vector.broadcast %cst_18 : f32 to vector<2x16x1xf32>
    %33 = arith.divf %31, %32 : vector<2x16x1xf32>
    %34 = vector.extract_strided_slice %33 {offsets = [0, 2, 0], sizes = [2, 14, 1], strides = [1, 1, 1]} : vector<2x16x1xf32> to vector<2x14x1xf32>
    %35 = vector.extract_strided_slice %33 {offsets = [0, 0, 0], sizes = [2, 14, 1], strides = [1, 1, 1]} : vector<2x16x1xf32> to vector<2x14x1xf32>
    %36 = arith.subf %34, %35 : vector<2x14x1xf32>
    %cst_19 = arith.constant 2.000000e-01 : f32
    %37 = vector.broadcast %cst_19 : f32 to vector<2x14x1xf32>
    %38 = arith.subf %36, %37 : vector<2x14x1xf32>
    %cst_20 = arith.constant 1.500000e+00 : f32
    %39 = vector.broadcast %cst_20 : f32 to vector<2x14x1xf32>
    %40 = arith.divf %38, %39 : vector<2x14x1xf32>
    %41 = tpu.iota {dimensions = array<i32: 2>} : vector<2x14x128xi32>
    %42 = vector.shape_cast %40 : vector<2x14x1xf32> to vector<2x14x1xf32>
    %43 = vector.broadcast %42 : vector<2x14x1xf32> to vector<2x14x128xf32>
    %c32_i32 = arith.constant 32 : i32
    %44 = vector.broadcast %c32_i32 : i32 to vector<2x14x128xi32>
    %45 = arith.cmpi eq, %41, %44 : vector<2x14x128xi32>
    %cst_21 = arith.constant 0.000000e+00 : f32
    %46 = vector.broadcast %cst_21 : f32 to vector<2x14x128xf32>
    %47 = arith.select %45, %43, %46 : vector<2x14x128xi1>, vector<2x14x128xf32>
    %48 = arith.addf %28, %47 : vector<2x14x128xf32>
    %c0_22 = arith.constant 0 : index
    %c0_23 = arith.constant 0 : index
    %c0_24 = arith.constant 0 : index
    %49 = vector.load %arg7[%c0_22, %c0_23, %c0_24] : memref<2x14x128xf32, #tpu.memory_space<vmem>>, vector<2x14x128xf32>
    tpu.vector_store %arg7[%c0_22, %c0_23, %c0_24], %48 {strides = array<i32>} : memref<2x14x128xf32, #tpu.memory_space<vmem>>, vector<2x14x128xf32>,
    return
  }
  func.func @transform_0(%arg0: i32) -> (i32, i32, i32) {
    %c0_i32 = arith.constant 0 : i32
    %c0_i32_0 = arith.constant 0 : i32
    %c0_i32_1 = arith.constant 0 : i32
    return %arg0, %c0_i32, %c0_i32_0 : i32, i32, i32
  }
  func.func @transform_1(%arg0: i32) -> (i32, i32, i32) {
    %c0_i32 = arith.constant 0 : i32
    %c0_i32_0 = arith.constant 0 : i32
    %c0_i32_1 = arith.constant 0 : i32
    return %arg0, %c0_i32, %c0_i32_0 : i32, i32, i32
  }
  func.func @transform_2(%arg0: i32) -> (i32, i32) {
    %c0_i32 = arith.constant 0 : i32
    %c0_i32_0 = arith.constant 0 : i32
    %c0_i32_1 = arith.constant 0 : i32
    return %c0_i32, %c0_i32_0 : i32, i32
  }
  func.func @transform_3(%arg0: i32) -> (i32, i32) {
    %c0_i32 = arith.constant 0 : i32
    %c0_i32_0 = arith.constant 0 : i32
    %c0_i32_1 = arith.constant 0 : i32
    return %c0_i32, %c0_i32_0 : i32, i32
  }
  func.func @transform_4(%arg0: i32) -> (i32, i32) {
    %c0_i32 = arith.constant 0 : i32
    %c0_i32_0 = arith.constant 0 : i32
    %c0_i32_1 = arith.constant 0 : i32
    return %c0_i32, %c0_i32_0 : i32, i32
  }
  func.func @transform_5(%arg0: i32) -> (i32, i32) {
    %c0_i32 = arith.constant 0 : i32
    %c0_i32_0 = arith.constant 0 : i32
    %c0_i32_1 = arith.constant 0 : i32
    return %c0_i32, %c0_i32_0 : i32, i32
  }
  func.func @transform_6(%arg0: i32) -> (i32, i32, i32) {
    %c0_i32 = arith.constant 0 : i32
    %c0_i32_0 = arith.constant 0 : i32
    %c0_i32_1 = arith.constant 0 : i32
    return %arg0, %c0_i32, %c0_i32_0 : i32, i32, i32
  }
}

</mosaic_0001>

<bundles_post_ra>
// kernel: tpu_custom_call.1
= control target key start
LH: loop header
LB: loop body
LE: loop exit
PB: predicated region body
PF: predicated region fallthrough
CT: control target
= control target key end

     0   :  { %vm45_vm0 = vcmask 1043456   ;;  %vm32_vm1 = vcmask 31744   ;;  %v620_v5 = vmov 1.5   ;;  %v621_v16 = vmov 0   ;;  %s622_s10 = smov 32   ;;  %s623_s11 = smov 16   ;;  %s864_s2 = inlined_call_operand.vmem [shape: f32[4,16], index: 2, kind: input, shape index: {}]   ;;  %s865_s0 = inlined_call_operand.vmem [shape: f32[2,16,4], index: 0, kind: input, shape index: {}]   ;;  %s866_s3 = inlined_call_operand.vmem [shape: f32[1,16], index: 3, kind: input, shape index: {}]   ;;  %s867_s1 = inlined_call_operand.vmem [shape: f32[2,16,1], index: 1, kind: input, shape index: {}]   ;;  %s868_s5 = inlined_call_operand.vmem [shape: f32[1,128], index: 5, kind: input, shape index: {}]   ;;  %s869_s4 = inlined_call_operand.vmem [shape: f32[48,128], index: 4, kind: input, shape index: {}]   ;;  %s870_s6 = inlined_call_operand.vmem [shape: f32[2,14,128], index: 6, kind: output, shape index: {}]  }
   0x1   :  { %v27_v0 = vld [vmem:[%s864_s2] sm:$0xf]  ;;  %v24_v1 = vld [vmem:[%s865_s0 + $0x8] sm:$0xff]  ;;  %v25_v3 = vld [vmem:[%s865_s0 + $0x10] sm:$0xff]  ;;  %582 = vrcp.f32 %v620_v5  ;;  %578 = vset.pattern.permute.xlu0 %v621_v16  ;;  %579 = vset.pattern.permute.xlu1 %v621_v16  ;;  %vm86_vm3 = vcmask 1046528   ;;  %vm105_vm4 = vcmask 1045504  }
   0x2   :  { %v23_v2 = vld [vmem:[%s865_s0] sm:$0xff]  ;;  %560 = vmatpush.msk.msra.mxu3 %vm45_vm0, %v27_v0  ;;  %529 = vmatpush.msk.msra.mxu0 %vm45_vm0, %v27_v0  ;;  %v26_v4 = vld [vmem:[%s865_s0 + $0x18] sm:$0xff]  ;;  %v350_v18 = vld [vmem:[%s867_s1 + $0x8] sm:$0xff]  ;;  %vm372_vm5 = vcmask 1041408   ;;  %vm124_vm6 = vcmask 130048   ;;  %vm129_vm7 = vcmask 261120  }
   0x3   :  { %531 = vmatmul.msk.f32.vlgmr.msra.gmra.mxu3 %vm32_vm1, %v24_v1  ;;  %530 = vmatmul.msk.f32.vlgmr.msra.gmra.mxu0 %vm32_vm1, %v23_v2  ;;  %v580_v6 = vld [vmem:[%s866_s3] ss:$0 sm:$0xff]  ;;  %v553_v26 = vadd.f32 -0.2, %v350_v18  ;;  %v352_v32 = vld [vmem:[%s867_s1 + $0x18] sm:$0xff]  ;;  %v351_v36 = vld [vmem:[%s867_s1 + $0x10] sm:$0xff] }
   0x4   :  { %v349_v17 = vld [vmem:[%s867_s1] sm:$0xff]  ;;  %577 = vset.pattern.permute.xlu2 %v621_v16  ;;  %v555_v39 = vadd.f32 -0.2, %v352_v32  ;;  %v554_v41 = vadd.f32 -0.2, %v351_v36  ;;  %vm179_vm8 = vcmask 392192  }
   0x5   :  { %v552_v25 = vadd.f32 -0.2, %v349_v17  ;;  %v152_v5 = vld [vmem:[%s869_s4 + $0x20] sm:$0xff] }
   0x7   :  { %v583_v8 = vpop.eup %582 }
   0x8   :  { %v358_v10 = vmul.f32 1.5, %v583_v8  ;;  %vm362_vm2 = vweird.f32 %v583_v8 }
   0xa   :  { %v359_v11 = vsub.f32 1.0, %v358_v10 }
   0xb   :  { %532 = vmatmul.msk.f32.gmra.mxu3 %vm32_vm1, %v25_v3 }
   0xc   :  { %v360_v14 = vmul.f32 %v583_v8, %v359_v11 }
   0xe   :  { %v361_v19 = vadd.f32 %v583_v8, %v360_v14 }
  0x10   :  { %v363_v27 = vsel %vm362_vm2, %v583_v8, %v361_v19  ;;  %v149_v8 = vld [vmem:[%s869_s4 + $0x8] sm:$0xff] }
  0x11   :  { %v364_v30 = vmul.f32 %v552_v25, %v363_v27  ;;  %v365_v31 = vmul.f32 %v553_v26, %v363_v27  ;;  %v367_v44 = vmul.f32 %v555_v39, %v363_v27  ;;  %v366_v45 = vmul.f32 %v554_v41, %v363_v27 }
  0x13   :  { %533 = vmatmul.msk.f32.gmra.mxu3 %vm32_vm1, %v26_v4  ;;  %v373_v37 = vrot.slane %v364_v30, 6  ;;  %v374_v38 = vrot.slane %v365_v31, 6  ;;  %v377_v53 = vrot.slane %v367_v44, 6  ;;  %v376_v56 = vrot.slane %v366_v45, 6  ;;  %v153_v4 = vld [vmem:[%s869_s4 + $0x28] sm:$0xff] }
  0x14   :  { %198 = vmatpush.msrb.mxu0 %v153_v4  ;;  %561 = vmatpush.msra.mxu1 %v153_v4 }
  0x15   :  { %v375_v43 = vsel %vm372_vm5, %v373_v37, %v374_v38  ;;  %v383_v49 = vsub.f32 %v364_v30, %v373_v37  ;;  %v378_v59 = vsel %vm372_vm5, %v376_v56, %v377_v53  ;;  %v385_v60 = vsub.f32 %v366_v45, %v376_v56  ;;  %562 = vmatpush.msra.mxu2 %v153_v4 }
  0x16   :  { %v384_v48 = vsub.f32 %v365_v31, %v375_v43  ;;  %v386_v62 = vsub.f32 %v367_v44, %v378_v59  ;;  %199 = vmatpush.msrb.mxu0 %v152_v5  ;;  %563 = vmatpush.msra.mxu1 %v152_v5  ;;  %v395_v30 = vlaneseq }
  0x17   :  { %v556_v57 = vadd.f32 -0.2, %v383_v49  ;;  %v558_v0 = vadd.f32 -0.2, %v385_v60  ;;  %564 = vmatpush.msra.mxu2 %v152_v5 }
  0x18   :  { %v557_v58 = vadd.f32 -0.2, %v384_v48  ;;  %v559_v1 = vadd.f32 -0.2, %v386_v62 }
  0x19   :  { %v391_v61 = vmul.f32 %v556_v57, %v363_v27  ;;  %v393_v2 = vmul.f32 %v558_v0, %v363_v27  ;;  %v774_v57 = vld [vmem:[%s868_s5] ss:$0 sm:$0xff] }
  0x1a   :  { %v392_v63 = vmul.f32 %v557_v58, %v363_v27  ;;  %v394_v3 = vmul.f32 %v559_v1, %v363_v27  ;;  %v777_v58 = vrot.slane %v774_v57, 2  ;;  %v780_v59 = vrot.slane %v774_v57, 4 }
  0x1b   :  { %v247_v60 = vrot.slane %v774_v57, 6 }
  0x80   :  { %v66_v7 = vpop.f32.mrf.mxu0 }
  0x81   :  { %v67_v9 = vadd.f32 %v580_v6, %v66_v7  ;;  %v150_v7 = vld [vmem:[%s869_s4 + $0x10] sm:$0xff] }
  0x83   :  { %584 = vtanh.f32 %v67_v9  ;;  %v148_v9 = vld [vmem:[%s869_s4] sm:$0xff] }
  0x86   :  { %v69_v12 = vpop.f32.mrf.mxu3 }
  0x87   :  { %v70_v13 = vadd.f32 %v580_v6, %v69_v12 }
  0x89   :  { %586 = vtanh.f32 %v70_v13  ;;  %v677_v15 = vpop.eup %584 }
  0x8a   :  { %v87_v21 = vrot.slane %v677_v15, 1  ;;  %v106_v34 = vrot.slane %v677_v15, 2 }
  0x8e   :  { %v72_v20 = vpop.f32.mrf.mxu3 }
  0x8f   :  { %v686_v22 = vpop.eup %586  ;;  %v73_v28 = vadd.f32 %v580_v6, %v72_v20 }
  0x90   :  { %v107_v23 = vrot.slane %v686_v22, 2  ;;  %v88_v24 = vrot.slane %v686_v22, 1 }
  0x91   :  { %588 = vtanh.f32 %v73_v28 }
  0x92   :  { %114 = vrot.lane.b32.xlu2 %v107_v23, %s622_s10  ;;  %95 = vrot.lane.b32.xlu1 %v88_v24, %s623_s11  ;;  %v89_v29 = vsel %vm86_vm3, %v87_v21, %v88_v24  ;;  %v108_v40 = vsel %vm105_vm4, %v106_v34, %v107_v23 }
  0x93   :  { %93 = vrot.lane.b32.xlu0 %v89_v29, %s623_s11 }
  0x96   :  { %v75_v33 = vpop.f32.mrf.mxu3 }
  0x97   :  { %v76_v35 = vadd.f32 %v580_v6, %v75_v33  ;;  %v703_v42 = vpop.eup %588  ;;  %v151_v6 = vld [vmem:[%s869_s4 + $0x18] sm:$0xff] }
  0x98   :  { %v109_v47 = vrot.slane %v703_v42, 2  ;;  %v90_v51 = vrot.slane %v703_v42, 1  ;;  %200 = vmatpush.msrb.mxu0 %v151_v6  ;;  %565 = vmatpush.msra.mxu1 %v151_v6 }
  0x99   :  { %590 = vtanh.f32 %v76_v35  ;;  %566 = vmatpush.msra.mxu2 %v151_v6  ;;  %v396_v35 = vand.u32 127, %v395_v30 }
  0x9a   :  { %201 = vmatpush.msrb.mxu0 %v150_v7  ;;  %567 = vmatpush.msra.mxu1 %v150_v7 }
  0x9b   :  { %112 = vrot.lane.b32.xlu0 %v108_v40, %s622_s10  ;;  %568 = vmatpush.msra.mxu2 %v150_v7  ;;  %vm417_vm9 = vcmp.eq.s32.totalorder %v396_v35, 32 }
  0x9c   :  { %202 = vmatpush.msrb.mxu0 %v149_v8  ;;  %569 = vmatpush.msra.mxu1 %v149_v8 }
  0x9d   :  { %570 = vmatpush.msra.mxu2 %v149_v8 }
  0x9e   :  { %203 = vmatpush.msrb.mxu0 %v148_v9  ;;  %571 = vmatpush.msra.mxu1 %v148_v9 }
  0x9f   :  { %v706_v46 = vpop.eup %590  ;;  %572 = vmatpush.msra.mxu2 %v148_v9 }
  0xa0   :  { %v110_v50 = vrot.slane %v706_v46, 2  ;;  %v91_v52 = vrot.slane %v706_v46, 1 }
  0xa2   :  { %v111_v54 = vsel %vm105_vm4, %v109_v47, %v110_v50  ;;  %v92_v55 = vsel %vm86_vm3, %v90_v51, %v91_v52 }
  0xa3   :  { %116 = vrot.lane.b32.xlu2 %v111_v54, %s622_s10  ;;  %97 = vrot.lane.b32.xlu1 %v92_v55, %s623_s11 }
  0xa4   :  { %99 = vrot.lane.b32.xlu0 %v91_v52, %s623_s11 }
  0xab   :  { %118 = vrot.lane.b32.xlu1 %v110_v50, %s622_s10  ;;  %399 = vperm.xlu2 %577, %v391_v61  }
  0xac   :  { %404 = vperm.xlu0 %578, %v392_v63  }
  0xb3   :  { %409 = vperm.xlu1 %579, %v393_v2   ;;  %414 = vperm.xlu2 %577, %v394_v3  }
  0xec   :  { %v115_v11 = vpop.permute.xlu2 %114 }
  0xfd   :  { %v117_v25 = vpop.permute.xlu2 %116 }
 0x104   :  { %v96_v10 = vpop.permute.xlu1 %95 }
 0x105   :  { %v126_v12 = vsel %vm124_vm6, %v686_v22, %v96_v10  ;;  %v94_v13 = vpop.permute.xlu0 %93  ;;  %v400_v40 = vpop.permute.xlu2 %399 }
 0x106   :  { %v131_v14 = vsel %vm129_vm7, %v126_v12, %v115_v11  ;;  %v125_v18 = vsel %vm124_vm6, %v677_v15, %v94_v13  ;;  %v418_v41 = vsel %vm417_vm9, %v400_v40, 0.0 }
 0x107   :  { %v141_v16 = vrot.slane %v131_v14, 2  ;;  %v142_v17 = vrot.slane %v131_v14, 4  ;;  %162 = vst [vmem:[#allocation1 + $0x20] ss:$4 sm:$0xff] %v131_v14 }
 0x109   :  { %164 = vst [vmem:[#allocation1 + $0x21] ss:$4 sm:$0xff] %v141_v16 }
 0x10a   :  { %166 = vst [vmem:[#allocation1 + $0x22] ss:$4 sm:$0xff] %v142_v17 }
 0x10d   :  { %v113_v19 = vpop.permute.xlu0 %112  ;;  %v415_v48 = vpop.permute.xlu2 %414 }
 0x10e   :  { %v130_v20 = vsel %vm129_vm7, %v125_v18, %v113_v19  ;;  %v421_v52 = vsel %vm417_vm9, %v415_v48, 0.0 }
 0x10f   :  { %v138_v21 = vrot.slane %v130_v20, 2  ;;  %v139_v23 = vrot.slane %v130_v20, 4  ;;  %v140_v24 = vrot.slane %v130_v20, 6  ;;  %154 = vst [vmem:[#allocation1] ss:$4 sm:$0xff] %v130_v20 }
 0x111   :  { %156 = vst [vmem:[#allocation1 + $0x1] ss:$4 sm:$0xff] %v138_v21 }
 0x112   :  { %158 = vst [vmem:[#allocation1 + $0x2] ss:$4 sm:$0xff] %v139_v23 }
 0x113   :  { %160 = vst [vmem:[#allocation1 + $0x3] ss:$4 sm:$0xff] %v140_v24 }
 0x115   :  { %v98_v22 = vpop.permute.xlu1 %97 }
 0x116   :  { %v127_v26 = vsel %vm124_vm6, %v703_v42, %v98_v22  ;;  %v100_v31 = vpop.permute.xlu0 %99 }
 0x117   :  { %v132_v27 = vsel %vm129_vm7, %v127_v26, %v117_v25  ;;  %v128_v33 = vsel %vm124_vm6, %v706_v46, %v100_v31 }
 0x118   :  { %v143_v28 = vrot.slane %v132_v27, 2  ;;  %v144_v29 = vrot.slane %v132_v27, 4  ;;  %168 = vst [vmem:[#allocation1 + $0x23] ss:$4 sm:$0xff] %v132_v27  ;;  %v145_v15 = vrot.slane %v132_v27, 6 }
 0x11a   :  { %v169_v32 = vld.sshfl [vmem:[#allocation1] sm:$0xff pattern:$0x73625140] }
 0x11b   :  { %171 = vst [vmem:[#allocation1] ss:$4 sm:$0xff] %v143_v28  ;;  %534 = vmatmul.msk.f32.vlgmr.msrb.gmra.mxu0 %vm179_vm8, %v169_v32 }
 0x11c   :  { %172 = vst [vmem:[#allocation1 + $0x1] ss:$4 sm:$0xff] %v144_v29 }
 0x11d   :  { %173 = vst [vmem:[#allocation1 + $0x2] ss:$4 sm:$0xff] %v145_v15  ;;  %v119_v34 = vpop.permute.xlu1 %118 }
 0x11e   :  { %v133_v36 = vsel %vm129_vm7, %v128_v33, %v119_v34  ;;  %v405_v42 = vpop.permute.xlu0 %404 }
 0x11f   :  { %v146_v37 = vrot.slane %v133_v36, 2  ;;  %v147_v38 = vrot.slane %v133_v36, 4  ;;  %174 = vst [vmem:[#allocation1 + $0x3] ss:$4 sm:$0xff] %v133_v36  ;;  %v419_v44 = vsel %vm417_vm9, %v405_v42, 0.0 }
 0x120   :  { %v170_v39 = vld.sshfl [vmem:[#allocation1 + $0x20] sm:$0xff pattern:$0x73625140] }
 0x121   :  { %175 = vst [vmem:[#allocation1 + $0x20] ss:$4 sm:$0xff] %v146_v37  ;;  %535 = vmatmul.msk.f32.vlgmr.msra.gmra.mxu1 %vm179_vm8, %v170_v39 }
 0x122   :  { %176 = vst [vmem:[#allocation1 + $0x21] ss:$4 sm:$0xff] %v147_v38 }
 0x125   :  { %v410_v45 = vpop.permute.xlu1 %409 }
 0x126   :  { %v177_v43 = vld.sshfl [vmem:[#allocation1] sm:$0xff pattern:$0x73625140]  ;;  %v420_v47 = vsel %vm417_vm9, %v410_v45, 0.0 }
 0x127   :  { %536 = vmatmul.msk.f32.vlgmr.msra.gmra.mxu2 %vm179_vm8, %v177_v43  ;;  %426 = vst.sshfl [vmem:[#allocation1] sm:$0xff pattern:$0x73625140] %v418_v41 }
 0x129   :  { %v178_v46 = vld.sshfl [vmem:[#allocation1 + $0x20] sm:$0xff pattern:$0x73625140] }
 0x12a   :  { %427 = vst.sshfl [vmem:[#allocation1 + $0x20] sm:$0xff pattern:$0x73625140] %v419_v44 }
 0x12e   :  { %v755_v49 = vld [vmem:[#allocation1 + $0x1] ss:$4 sm:$0xff]  ;;  %v757_v50 = vld [vmem:[#allocation1 + $0x2] ss:$4 sm:$0xff]  ;;  %v759_v51 = vld [vmem:[#allocation1 + $0x3] ss:$4 sm:$0xff] }
 0x12f   :  { %442 = vst.sshfl [vmem:[#allocation1] sm:$0xff pattern:$0x73625140] %v420_v47  ;;  %537 = vmatmul.msk.f32.gmra.mxu2 %vm179_vm8, %v178_v46 }
 0x131   :  { %v763_v53 = vld [vmem:[#allocation1 + $0x20] ss:$4 sm:$0xff]  ;;  %v765_v54 = vld [vmem:[#allocation1 + $0x21] ss:$4 sm:$0xff]  ;;  %v767_v55 = vld [vmem:[#allocation1 + $0x22] ss:$4 sm:$0xff] }
 0x132   :  { %v769_v56 = vld [vmem:[#allocation1 + $0x23] ss:$4 sm:$0xff] }
 0x133   :  { %443 = vst.sshfl [vmem:[#allocation1 + $0x20] sm:$0xff pattern:$0x73625140] %v421_v52 }
 0x136   :  { %v444_v48 = vld [vmem:[#allocation1 + $0x1] ss:$4 sm:$0xff] }
 0x198   :  { %v205_v61 = vpop.f32.mrf.mxu0 }
 0x199   :  { %v221_v62 = vrot.slane %v205_v61, 2  ;;  %v222_v63 = vrot.slane %v205_v61, 4  ;;  %v223_v0 = vrot.slane %v205_v61, 6  ;;  %v251_v1 = vadd.f32 %v774_v57, %v205_v61 }
 0x19b   :  { %v252_v2 = vadd.f32 %v777_v58, %v221_v62  ;;  %v253_v3 = vadd.f32 %v780_v59, %v222_v63  ;;  %v254_v4 = vadd.f32 %v247_v60, %v223_v0  ;;  %v279_v5 = vmin.f32 %v251_v1, 0.0  ;;  %v818_v0 = vld [vmem:[#allocation1 + $0x2] ss:$4 sm:$0xff] }
 0x19c   :  { %vm265_vm10 = vcmp.gt.f32.partialorder %v251_v1, 0.0 }
 0x19d   :  { %v280_v6 = vmin.f32 %v252_v2, 0.0  ;;  %v281_v7 = vmin.f32 %v253_v3, 0.0  ;;  %v282_v8 = vmin.f32 %v254_v4, 0.0  ;;  %v293_v9 = vmul.f32 1.442695, %v279_v5 }
 0x19e   :  { %v208_v10 = vpop.f32.mrf.mxu1  ;;  %vm266_vm11 = vcmp.gt.f32.partialorder %v252_v2, 0.0  ;;  %vm267_vm12 = vcmp.gt.f32.partialorder %v253_v3, 0.0  ;;  %vm268_vm13 = vcmp.gt.f32.partialorder %v254_v4, 0.0 }
 0x19f   :  { %v295_v11 = vmul.f32 1.442695, %v280_v6  ;;  %v224_v12 = vrot.slane %v208_v10, 2  ;;  %v225_v13 = vrot.slane %v208_v10, 4  ;;  %v226_v14 = vrot.slane %v208_v10, 6 }
 0x1a0   :  { %592 = vpow2.f32 %v293_v9  ;;  %v297_v16 = vmul.f32 1.442695, %v281_v7  ;;  %v299_v17 = vmul.f32 1.442695, %v282_v8  ;;  %v789_v18 = vadd.f32 %v774_v57, %v208_v10 }
 0x1a1   :  { %594 = vpow2.f32 %v295_v11  ;;  %v792_v19 = vadd.f32 %v777_v58, %v224_v12  ;;  %v795_v20 = vadd.f32 %v780_v59, %v225_v13  ;;  %v798_v21 = vadd.f32 %v774_v57, %v226_v14  ;;  %v447_v12 = vld [vmem:[#allocation1 + $0x20] ss:$4 sm:$0xff] }
 0x1a2   :  { %596 = vpow2.f32 %v297_v16  ;;  %v283_v23 = vmin.f32 %v789_v18, 0.0  ;;  %vm269_vm14 = vcmp.gt.f32.partialorder %v789_v18, 0.0 }
 0x1a3   :  { %598 = vpow2.f32 %v299_v17  ;;  %v284_v24 = vmin.f32 %v792_v19, 0.0  ;;  %v285_v22 = vmin.f32 %v795_v20, 0.0  ;;  %v286_v25 = vmin.f32 %v798_v21, 0.0 }
 0x1a4   :  { %v301_v26 = vmul.f32 1.442695, %v283_v23  ;;  %vm270_vm15 = vcmp.gt.f32.partialorder %v792_v19, 0.0  ;;  %vm271_vm0 = vcmp.gt.f32.partialorder %v795_v20, 0.0  ;;  %vm272_vm1 = vcmp.gt.f32.partialorder %v798_v21, 0.0 }
 0x1a5   :  { %v303_v28 = vmul.f32 1.442695, %v284_v24  ;;  %v305_v29 = vmul.f32 1.442695, %v285_v22  ;;  %v307_v15 = vmul.f32 1.442695, %v286_v25 }
 0x1a6   :  { %v593_v27 = vpop.eup %592  ;;  %600 = vpow2.f32 %v301_v26 }
 0x1a7   :  { %v595_v30 = vpop.eup %594  ;;  %v538_v31 = vadd.f32 -1.0, %v593_v27  ;;  %602 = vpow2.f32 %v303_v28 }
 0x1a8   :  { %v597_v32 = vpop.eup %596  ;;  %v539_v33 = vadd.f32 -1.0, %v595_v30  ;;  %604 = vpow2.f32 %v305_v29 }
 0x1a9   :  { %v599_v34 = vpop.eup %598  ;;  %v540_v35 = vadd.f32 -1.0, %v597_v32  ;;  %v335_v36 = vsel %vm265_vm10, %v251_v1, %v538_v31  ;;  %606 = vpow2.f32 %v307_v15 }
 0x1aa   :  { %v541_v37 = vadd.f32 -1.0, %v599_v34  ;;  %v336_v38 = vsel %vm266_vm11, %v252_v2, %v539_v33  ;;  %v465_v39 = vadd.f32 %v755_v49, %v335_v36  ;;  %v211_v40 = vpop.f32.mrf.mxu2 }
 0x1ab   :  { %v337_v41 = vsel %vm267_vm12, %v253_v3, %v540_v35  ;;  %v466_v42 = vadd.f32 %v757_v50, %v336_v38  ;;  %v227_v43 = vrot.slane %v211_v40, 2  ;;  %v228_v44 = vrot.slane %v211_v40, 4 }
 0x1ac   :  { %v601_v45 = vpop.eup %600  ;;  %v338_v46 = vsel %vm268_vm13, %v254_v4, %v541_v37  ;;  %v467_v47 = vadd.f32 %v759_v51, %v337_v41  ;;  %493 = vst [vmem:[#allocation1] ss:$4 sm:$0xff] %v465_v39  ;;  %v229_v52 = vrot.slane %v211_v40, 6  ;;  %v808_v61 = vadd.f32 %v777_v58, %v211_v40 }
 0x1ad   :  { %v468_v62 = vadd.f32 %v763_v53, %v338_v46  ;;  %v542_v49 = vadd.f32 -1.0, %v601_v45  ;;  %495 = vst [vmem:[#allocation1 + $0x1] ss:$4 sm:$0xff] %v466_v42  ;;  %v812_v63 = vadd.f32 %v780_v59, %v227_v43  ;;  %v816_v50 = vadd.f32 %v247_v60, %v228_v44  ;;  %v603_v51 = vpop.eup %602  ;;  %v825_v53 = vld [vmem:[#allocation1 + $0x3] ss:$4 sm:$0xff] }
 0x1ae   :  { %v822_v1 = vadd.f32 %v774_v57, %v229_v52  ;;  %v287_v2 = vmin.f32 %v808_v61, 0.0  ;;  %497 = vst [vmem:[#allocation1 + $0x2] ss:$4 sm:$0xff] %v467_v47  ;;  %v605_v3 = vpop.eup %604  ;;  %v543_v60 = vadd.f32 -1.0, %v603_v51  ;;  %vm273_vm2 = vcmp.gt.f32.partialorder %v808_v61, 0.0 }
 0x1af   :  { %v339_v4 = vsel %vm269_vm14, %v789_v18, %v542_v49  ;;  %499 = vst [vmem:[#allocation1 + $0x3] ss:$4 sm:$0xff] %v468_v62  ;;  %v607_v5 = vpop.eup %606  ;;  %v544_v6 = vadd.f32 -1.0, %v605_v3  ;;  %v288_v7 = vmin.f32 %v812_v63, 0.0  ;;  %v289_v10 = vmin.f32 %v816_v50, 0.0 }
 0x1b0   :  { %v469_v57 = vadd.f32 %v765_v54, %v339_v4  ;;  %v545_v8 = vadd.f32 -1.0, %v607_v5  ;;  %v340_v9 = vsel %vm270_vm15, %v792_v19, %v543_v60  ;;  %v290_v11 = vmin.f32 %v822_v1, 0.0  ;;  %v448_v19 = vld [vmem:[#allocation1 + $0x21] ss:$4 sm:$0xff]  ;;  %v450_v49 = vld [vmem:[#allocation1 + $0x23] ss:$4 sm:$0xff] }
 0x1b1   :  { %v341_v13 = vsel %vm271_vm0, %v795_v20, %v544_v6  ;;  %v470_v14 = vadd.f32 %v767_v55, %v340_v9  ;;  %v309_v16 = vmul.f32 1.442695, %v287_v2  ;;  %v311_v17 = vmul.f32 1.442695, %v288_v7  ;;  %v449_v20 = vld [vmem:[#allocation1 + $0x22] ss:$4 sm:$0xff] }
 0x1b2   :  { %501 = vst [vmem:[#allocation1 + $0x20] ss:$4 sm:$0xff] %v469_v57  ;;  %v214_v18 = vpop.f32.mrf.mxu2  ;;  %v342_v54 = vsel %vm272_vm1, %v798_v21, %v545_v8  ;;  %v471_v23 = vadd.f32 %v769_v56, %v341_v13  ;;  %v313_v24 = vmul.f32 1.442695, %v289_v10  ;;  %v315_v22 = vmul.f32 1.442695, %v290_v11 }
 0x1b3   :  { %v472_v25 = vadd.f32 %v444_v48, %v342_v54  ;;  %608 = vpow2.f32 %v309_v16  ;;  %503 = vst [vmem:[#allocation1 + $0x21] ss:$4 sm:$0xff] %v470_v14  ;;  %v230_v26 = vrot.slane %v214_v18, 2  ;;  %v263_v27 = vadd.f32 %v777_v58, %v214_v18 }
 0x1b4   :  { %610 = vpow2.f32 %v311_v17  ;;  %505 = vst [vmem:[#allocation1 + $0x22] ss:$4 sm:$0xff] %v471_v23  ;;  %vm274_vm3 = vcmp.gt.f32.partialorder %v812_v63, 0.0  ;;  %vm275_vm4 = vcmp.gt.f32.partialorder %v816_v50, 0.0  ;;  %vm276_vm5 = vcmp.gt.f32.partialorder %v822_v1, 0.0 }
 0x1b5   :  { %612 = vpow2.f32 %v313_v24  ;;  %v264_v28 = vadd.f32 %v780_v59, %v230_v26  ;;  %v291_v29 = vmin.f32 %v263_v27, 0.0  ;;  %vm277_vm6 = vcmp.gt.f32.partialorder %v263_v27, 0.0 }
 0x1b6   :  { %v506_v55 = vld.sshfl [vmem:[#allocation1] sm:$0xff pattern:$0x73625140]  ;;  %614 = vpow2.f32 %v315_v22 }
 0x1b7   :  { %508 = vst [vmem:[#allocation1] ss:$4 sm:$0xff] %v472_v25  ;;  %v292_v56 = vmin.f32 %v264_v28, 0.0  ;;  %v317_v21 = vmul.f32 1.442695, %v291_v29  ;;  %vm278_vm7 = vcmp.gt.f32.partialorder %v264_v28, 0.0 }
 0x1b8   :  { %521 = vst [vmem:[%s870_s6] sm:$0xff] %v506_v55 }
 0x1b9   :  { %v609_v15 = vpop.eup %608  ;;  %616 = vpow2.f32 %v317_v21  ;;  %v319_v30 = vmul.f32 1.442695, %v292_v56 }
 0x1ba   :  { %v611_v58 = vpop.eup %610  ;;  %v546_v31 = vadd.f32 -1.0, %v609_v15 }
 0x1bb   :  { %v613_v32 = vpop.eup %612  ;;  %v547_v33 = vadd.f32 -1.0, %v611_v58  ;;  %618 = vpow2.f32 %v319_v30  ;;  %v507_v59 = vld.sshfl [vmem:[#allocation1 + $0x20] sm:$0xff pattern:$0x73625140] }
 0x1bc   :  { %v615_v34 = vpop.eup %614  ;;  %v548_v35 = vadd.f32 -1.0, %v613_v32  ;;  %v343_v36 = vsel %vm273_vm2, %v808_v61, %v546_v31  ;;  %522 = vst [vmem:[%s870_s6 + $0x8] sm:$0x3f] %v507_v59 }
 0x1bd   :  { %v549_v37 = vadd.f32 -1.0, %v615_v34  ;;  %v344_v38 = vsel %vm274_vm3, %v812_v63, %v547_v33  ;;  %v473_v39 = vadd.f32 %v818_v0, %v343_v36 }
 0x1be   :  { %v345_v40 = vsel %vm275_vm4, %v816_v50, %v548_v35  ;;  %v474_v41 = vadd.f32 %v825_v53, %v344_v38 }
 0x1bf   :  { %v617_v42 = vpop.eup %616  ;;  %v346_v43 = vsel %vm276_vm5, %v822_v1, %v549_v37  ;;  %v475_v44 = vadd.f32 %v447_v12, %v345_v40  ;;  %509 = vst [vmem:[#allocation1 + $0x1] ss:$4 sm:$0xff] %v473_v39 }
 0x1c0   :  { %v476_v45 = vadd.f32 %v448_v19, %v346_v43  ;;  %510 = vst [vmem:[#allocation1 + $0x2] ss:$4 sm:$0xff] %v474_v41  ;;  %v550_v46 = vadd.f32 -1.0, %v617_v42 }
 0x1c1   :  { %v619_v47 = vpop.eup %618  ;;  %511 = vst [vmem:[#allocation1 + $0x3] ss:$4 sm:$0xff] %v475_v44 }
 0x1c2   :  { %v551_v48 = vadd.f32 -1.0, %v619_v47  ;;  %v347_v52 = vsel %vm277_vm6, %v263_v27, %v550_v46  ;;  %512 = vst [vmem:[#allocation1 + $0x20] ss:$4 sm:$0xff] %v476_v45 }
 0x1c3   :  { %v477_v61 = vadd.f32 %v449_v20, %v347_v52 }
 0x1c4   :  { %v348_v62 = vsel %vm278_vm7, %v264_v28, %v551_v48 }
 0x1c5   :  { %v478_v63 = vadd.f32 %v450_v49, %v348_v62  ;;  %513 = vst [vmem:[#allocation1 + $0x21] ss:$4 sm:$0xff] %v477_v61 }
 0x1c7   :  { %514 = vst [vmem:[#allocation1 + $0x22] ss:$4 sm:$0xff] %v478_v63 }
 0x1c8   :  { %v515_v50 = vld.sshfl [vmem:[#allocation1] sm:$0xff pattern:$0x73625140] }
 0x1c9   :  { %523 = vst [vmem:[%s870_s6 + $0x10] sm:$0xff] %v515_v50 }
 0x1ce   :  { %v516_v0 = vld.sshfl [vmem:[#allocation1 + $0x20] sm:$0xff pattern:$0x73625140] }
 0x1cf   :  { %524 = vst [vmem:[%s870_s6 + $0x18] sm:$0x3f] %v516_v0 }

</bundles_post_ra>
